<compile_context>
chip_gen: v7x
topology: tpu7x:2x2x1
jax: 0.10.0
libtpu: 0.0.40
codegen_flags: <defaults>
</compile_context>

<pallas_src>
import functools

import numpy as np

import jax
import jax.numpy as jnp
from jax.experimental import pallas as pl
from jax.experimental.pallas import tpu as pltpu


_LANE = 128
_MAX_UNROLL = 8


# ----------------------------------------------------------------------------
# Pooling matrices (PyTorch adaptive-pool window semantics), host-side numpy.
# ----------------------------------------------------------------------------
def _window_bounds(out_dim: int, in_dim: int):
    return [((o * in_dim) // out_dim,
             ((o + 1) * in_dim + out_dim - 1) // out_dim)
            for o in range(out_dim)]


@functools.lru_cache(maxsize=None)
def _pool_matrix_1d(in_dim: int, out_dim: int):
    """(out_dim, in_dim) f32; row o = 1/window_len over window(o)."""
    p = np.zeros((out_dim, in_dim), dtype=np.float32)
    for o, (s, e) in enumerate(_window_bounds(out_dim, in_dim)):
        n = max(e - s, 1)
        p[o, s:e] = 1.0 / float(n)
    return p


# ----------------------------------------------------------------------------
# Tiling heuristics.
# ----------------------------------------------------------------------------
def _vmem_budget_bytes():
    """~75% of physical VMEM (Mosaic needs internal scratch headroom)."""
    cap = 64 << 20
    try:
        info = pltpu.get_tpu_info()
        cap = int(getattr(info, "vmem_capacity_bytes", cap))
    except Exception:
        pass
    return max((cap * 3) // 4, 16 << 20)


def _largest_divisor_leq(n, cap):
    cap = max(1, min(n, cap))
    for d in range(cap, 0, -1):
        if n % d == 0:
            return d
    return 1


def _pick_lane_tile(m, bytes_per_lane_unit, max_block_bytes):
    """Largest 128-multiple divisor of m whose block fits; else smallest
    aligned divisor; else the full extent (covers m < 128)."""
    lane_divs = [d for d in range(_LANE, m + 1, _LANE) if m % d == 0]
    fitting = [d for d in lane_divs if d * bytes_per_lane_unit <= max_block_bytes]
    if fitting:
        return max(fitting)
    if lane_divs:
        return min(lane_divs)
    return m


def _pick_group(n, per_item_bytes, target_bytes, n_other, min_steps=4):
    """Group items along the leading axis so each DMA is ~target_bytes, but
    keep >=min_steps total grid steps (2 per TensorCore on v7x) if possible."""
    g = max(1, min(n, _MAX_UNROLL, target_bytes // max(per_item_bytes, 1)))
    g = _largest_divisor_leq(n, g)
    while g > 1 and (n // g) * n_other < min_steps:
        g = _largest_divisor_leq(n, g - 1)
    return int(g)


# ----------------------------------------------------------------------------
# Kernels.
# ----------------------------------------------------------------------------
def _make_h_kernel(tb):
    def kernel(ph_ref, x_ref, y_ref):
        # ph_ref: (out_h, in_h)   x_ref: (tb, in_h, L)   y_ref: (tb, out_h, L) f32
        ph = ph_ref[...]
        for i in range(tb):                      # small static unroll (tb <= 8)
            y_ref[i] = jnp.dot(ph, x_ref[i],
                               preferred_element_type=jnp.float32
                               ).astype(y_ref.dtype)
    return kernel


def _make_w_kernel(g):
    def kernel(pwt_ref, y_ref, o_ref):
        # pwt_ref: (out_w, in_w) f32   y_ref: (g, in_w, c_t) f32
        # o_ref:   (g, out_w, c_t)
        pwt = pwt_ref[...]
        for j in range(g):                       # small static unroll (g <= 8)
            o_ref[j] = jnp.dot(pwt, y_ref[j],
                               preferred_element_type=jnp.float32
                               ).astype(o_ref.dtype)
    return kernel


# ----------------------------------------------------------------------------
# Wrapper.
# ----------------------------------------------------------------------------
@functools.partial(jax.jit, static_argnames=("output_size",))
def adaptive_avg_pool2d(x, output_size):
    """Pallas TPU adaptive average pool, BHWC layout (forward only)."""
    if isinstance(output_size, int):
        output_size = (output_size, output_size)
    out_h, out_w = output_size
    b, in_h, in_w, c = x.shape

    x_dt = jnp.dtype(x.dtype)
    itemsize = x_dt.itemsize
    if x_dt in (jnp.dtype(jnp.bfloat16), jnp.dtype(jnp.float16)):
        p_dt = x_dt                        # native low-precision MXU path
    else:
        p_dt = jnp.dtype(jnp.float32)

    ph = jnp.asarray(_pool_matrix_1d(in_h, out_h), dtype=p_dt)        # (out_h, in_h)
    pwt = jnp.asarray(_pool_matrix_1d(in_w, out_w), dtype=jnp.float32)  # (out_w, in_w)

    budget = _vmem_budget_bytes()
    target = max(2 << 20, min(8 << 20, budget // 16))   # per-step DMA target

    # ---------------- pass 1: pool H (x viewed as (b, in_h, in_w*c)) --------
    m = in_w * c
    L = _pick_lane_tile(m, in_h * itemsize, target)
    n_l = m // L
    tb = _pick_group(b, in_h * L * itemsize, target, n_l)

    in_blk1 = tb * in_h * L * itemsize
    out_blk1 = tb * out_h * L * 4
    vmem1 = int(min(budget,
                    max(16 << 20,
                        2 * (in_blk1 + out_blk1)
                        + 2 * out_h * in_h * p_dt.itemsize + (4 << 20))))

    x2 = x.reshape(b, in_h, m)                 # wrapper-side layout plumbing (free)

    y = pl.pallas_call(
        _make_h_kernel(tb),
        out_shape=jax.ShapeDtypeStruct((b, out_h, m), jnp.float32),
        grid=(b // tb, n_l),
        in_specs=[
            pl.BlockSpec((out_h, in_h), lambda bi, li: (0, 0)),
            pl.BlockSpec((tb, in_h, L), lambda bi, li: (bi, 0, li)),
        ],
        out_specs=pl.BlockSpec((tb, out_h, L), lambda bi, li: (bi, 0, li)),
        compiler_params=pltpu.CompilerParams(
            dimension_semantics=("parallel", "parallel"),
            vmem_limit_bytes=vmem1),
    )(ph, x2)

    # ---------------- pass 2: pool W (y viewed as (b*out_h, in_w, c)) -------
    rows = b * out_h
    c_t = _pick_lane_tile(c, in_w * 4, target)
    n_c = c // c_t
    g = _pick_group(rows, in_w * c_t * 4, target, n_c)

    in_blk2 = g * in_w * c_t * 4
    out_blk2 = g * out_w * c_t * itemsize
    vmem2 = int(min(budget,
                    max(16 << 20,
                        2 * (in_blk2 + out_blk2)
                        + 2 * out_w * in_w * 4 + (4 << 20))))

    y2 = y.reshape(rows, in_w, c)              # free reshape

    out = pl.pallas_call(
        _make_w_kernel(g),
        out_shape=jax.ShapeDtypeStruct((rows, out_w, c), x.dtype),
        grid=(rows // g, n_c),
        in_specs=[
            pl.BlockSpec((out_w, in_w), lambda gi, ci: (0, 0)),
            pl.BlockSpec((g, in_w, c_t), lambda gi, ci: (gi, 0, ci)),
        ],
        out_specs=pl.BlockSpec((g, out_w, c_t), lambda gi, ci: (gi, 0, ci)),
        compiler_params=pltpu.CompilerParams(
            dimension_semantics=("parallel", "parallel"),
            vmem_limit_bytes=vmem2),
    )(pwt, y2)

    return out.reshape(b, out_h, out_w, c)


class OptimizedAdaptiveAvgPool2d:
    """JAX/Pallas counterpart of the PyTorch module (forward only)."""

    def __init__(self, output_size):
        self.output_size = (
            (output_size, output_size) if isinstance(output_size, int)
            else tuple(output_size))

    def __call__(self, x):
        assert x.ndim == 4, "input must be a 4-D BHWC tensor"
        return adaptive_avg_pool2d(x, self.output_size)

    # TODO(synk): backward pass (Triton atomic_add scatter) not implemented;
    # only the forward pass is required here.


# ----------------------------------------------------------------------------
# Pure-JAX reference (identical window semantics) for checking.
# ----------------------------------------------------------------------------
def _reference_adaptive_avg_pool2d(x, output_size):
    out_h, out_w = output_size
    xf = x.astype(jnp.float32)
    rows = []
    for (hs, he) in _window_bounds(out_h, x.shape[1]):
        cols = []
        for (ws, we) in _window_bounds(out_w, x.shape[2]):
            cols.append(jnp.mean(xf[:, hs:he, ws:we, :], axis=(1, 2)))
        rows.append(jnp.stack(cols, axis=1))
    return jnp.stack(rows, axis=1)


if __name__ == "__main__":
    key = jax.random.PRNGKey(0)
    k1, k2, k3 = jax.random.split(key, 3)

    # Case 1: small C (full-extent channel block), non-divisible 16 -> 5 pooling.
    x1 = jax.random.normal(k1, (2, 16, 16, 4), dtype=jnp.float32)
    out1 = jax.block_until_ready(OptimizedAdaptiveAvgPool2d(5)(x1))
    ref1 = _reference_adaptive_avg_pool2d(x1, (5, 5))
    assert out1.shape == (2, 5, 5, 4), out1.shape
    assert jnp.allclose(out1, ref1, atol=1e-5, rtol=1e-5), "case 1 mismatch"

    # Case 2: lane-sized channels (C=128), rectangular output (3, 5).
    x2 = jax.random.normal(k2, (2, 12, 12, 128), dtype=jnp.float32)
    out2 = jax.block_until_ready(OptimizedAdaptiveAvgPool2d((3, 5))(x2))
    ref2 = _reference_adaptive_avg_pool2d(x2, (3, 5))
    assert out2.shape == (2, 3, 5, 128), out2.shape
    assert jnp.allclose(out2, ref2, atol=1e-5, rtol=1e-5), "case 2 mismatch"

    # Case 3: bf16 input exercises the native bf16 MXU path (Ph in bf16).
    x3 = jax.random.normal(k3, (2, 16, 16, 128), dtype=jnp.bfloat16)
    out3 = jax.block_until_ready(OptimizedAdaptiveAvgPool2d(7)(x3))
    ref3 = _reference_adaptive_avg_pool2d(x3, (7, 7))
    assert out3.shape == (2, 7, 7, 128), out3.shape
    assert out3.dtype == jnp.bfloat16, out3.dtype
    assert jnp.allclose(out3.astype(jnp.float32), ref3, atol=3e-2, rtol=3e-2), \
        "case 3 mismatch"

    print("KERNEL_OK")
</pallas_src>

<mosaic_0001>
module attributes {stable_mosaic.version = 11 : i64} {
  func.func @kernel(%arg0: i32, %arg1: i32, %arg2: memref<5x16xf32, #tpu.memory_space<vmem>>, %arg3: memref<1x16x64xf32, #tpu.memory_space<vmem>>, %arg4: memref<1x5x64xf32, #tpu.memory_space<vmem>>) attributes {dimension_semantics = [#tpu.dimension_semantics<parallel>, #tpu.dimension_semantics<parallel>], iteration_bounds = array<i64: 2, 1>, scalar_prefetch = 0 : i64, scratch_operands = 0 : i64, tpu.core_type = #tpu.core_type<tc>, window_params = [{pipeline_mode = #tpu.pipeline_mode<synchronous>, transform_indices = @transform_0, window_bounds = array<i64: 5, 16>}, {transform_indices = @transform_1, window_bounds = array<i64: 1, 16, 64>}, {transform_indices = @transform_2, window_bounds = array<i64: 1, 5, 64>}]} {
    %c0 = arith.constant 0 : index
    %c0_0 = arith.constant 0 : index
    %0 = vector.load %arg2[%c0, %c0_0] : memref<5x16xf32, #tpu.memory_space<vmem>>, vector<5x16xf32>
    %c0_1 = arith.constant 0 : index
    %c0_2 = arith.constant 0 : index
    %c0_3 = arith.constant 0 : index
    %1 = vector.load %arg3[%c0_1, %c0_2, %c0_3] : memref<1x16x64xf32, #tpu.memory_space<vmem>>, vector<1x16x64xf32>
    %2 = vector.shape_cast %1 : vector<1x16x64xf32> to vector<16x64xf32>
    %cst = arith.constant dense<0.000000e+00> : vector<5x64xf32>
    %3 = tpu.matmul %0, %2, %cst {dimension_numbers = #tpu.dot_dimension_numbers<[1], [0], [0], [1], [0, 0, 1, 1], [], []>} : vector<5x16xf32>, vector<16x64xf32>, vector<5x64xf32> -> vector<5x64xf32>
    %c0_4 = arith.constant 0 : index
    %c0_5 = arith.constant 0 : index
    %c0_6 = arith.constant 0 : index
    %4 = vector.load %arg4[%c0_4, %c0_5, %c0_6] : memref<1x5x64xf32, #tpu.memory_space<vmem>>, vector<1x5x64xf32>
    %5 = vector.shape_cast %4 : vector<1x5x64xf32> to vector<5x64xf32>
    %6 = vector.shape_cast %3 : vector<5x64xf32> to vector<1x5x64xf32>
    tpu.vector_store %arg4[%c0_4, %c0_5, %c0_6], %6 {strides = array<i32>} : memref<1x5x64xf32, #tpu.memory_space<vmem>>, vector<1x5x64xf32>,
    return
  }
  func.func @transform_0(%arg0: i32, %arg1: i32) -> (i32, i32) {
    %c0_i32 = arith.constant 0 : i32
    %c0_i32_0 = arith.constant 0 : i32
    %c0_i32_1 = arith.constant 0 : i32
    return %c0_i32, %c0_i32_0 : i32, i32
  }
  func.func @transform_1(%arg0: i32, %arg1: i32) -> (i32, i32, i32) {
    %c0_i32 = arith.constant 0 : i32
    %c0_i32_0 = arith.constant 0 : i32
    return %arg0, %c0_i32, %arg1 : i32, i32, i32
  }
  func.func @transform_2(%arg0: i32, %arg1: i32) -> (i32, i32, i32) {
    %c0_i32 = arith.constant 0 : i32
    %c0_i32_0 = arith.constant 0 : i32
    return %arg0, %c0_i32, %arg1 : i32, i32, i32
  }
}

module attributes {stable_mosaic.version = 11 : i64} {
  func.func @kernel(%arg0: i32, %arg1: i32, %arg2: memref<5x16xf32, #tpu.memory_space<vmem>>, %arg3: memref<2x16x4xf32, #tpu.memory_space<vmem>>, %arg4: memref<2x5x4xf32, #tpu.memory_space<vmem>>) attributes {dimension_semantics = [#tpu.dimension_semantics<parallel>, #tpu.dimension_semantics<parallel>], iteration_bounds = array<i64: 5, 1>, scalar_prefetch = 0 : i64, scratch_operands = 0 : i64, tpu.core_type = #tpu.core_type<tc>, window_params = [{pipeline_mode = #tpu.pipeline_mode<synchronous>, transform_indices = @transform_0, window_bounds = array<i64: 5, 16>}, {transform_indices = @transform_1, window_bounds = array<i64: 2, 16, 4>}, {transform_indices = @transform_2, window_bounds = array<i64: 2, 5, 4>}]} {
    %c0 = arith.constant 0 : index
    %c0_0 = arith.constant 0 : index
    %0 = vector.load %arg2[%c0, %c0_0] : memref<5x16xf32, #tpu.memory_space<vmem>>, vector<5x16xf32>
    %c0_1 = arith.constant 0 : index
    %c0_2 = arith.constant 0 : index
    %c0_3 = arith.constant 0 : index
    %1 = vector.load %arg3[%c0_1, %c0_2, %c0_3] : memref<2x16x4xf32, #tpu.memory_space<vmem>>, vector<1x16x4xf32>
    %2 = vector.shape_cast %1 : vector<1x16x4xf32> to vector<16x4xf32>
    %cst = arith.constant dense<0.000000e+00> : vector<5x4xf32>
    %3 = tpu.matmul %0, %2, %cst {dimension_numbers = #tpu.dot_dimension_numbers<[1], [0], [0], [1], [0, 0, 1, 1], [], []>} : vector<5x16xf32>, vector<16x4xf32>, vector<5x4xf32> -> vector<5x4xf32>
    %c0_4 = arith.constant 0 : index
    %c0_5 = arith.constant 0 : index
    %c0_6 = arith.constant 0 : index
    %4 = vector.load %arg4[%c0_4, %c0_5, %c0_6] : memref<2x5x4xf32, #tpu.memory_space<vmem>>, vector<1x5x4xf32>
    %5 = vector.shape_cast %4 : vector<1x5x4xf32> to vector<5x4xf32>
    %6 = vector.shape_cast %3 : vector<5x4xf32> to vector<1x5x4xf32>
    tpu.vector_store %arg4[%c0_4, %c0_5, %c0_6], %6 {strides = array<i32>} : memref<2x5x4xf32, #tpu.memory_space<vmem>>, vector<1x5x4xf32>,
    %c1 = arith.constant 1 : index
    %c0_7 = arith.constant 0 : index
    %c0_8 = arith.constant 0 : index
    %7 = vector.load %arg3[%c1, %c0_7, %c0_8] : memref<2x16x4xf32, #tpu.memory_space<vmem>>, vector<1x16x4xf32>
    %8 = vector.shape_cast %7 : vector<1x16x4xf32> to vector<16x4xf32>
    %cst_9 = arith.constant dense<0.000000e+00> : vector<5x4xf32>
    %9 = tpu.matmul %0, %8, %cst_9 {dimension_numbers = #tpu.dot_dimension_numbers<[1], [0], [0], [1], [0, 0, 1, 1], [], []>} : vector<5x16xf32>, vector<16x4xf32>, vector<5x4xf32> -> vector<5x4xf32>
    %c1_10 = arith.constant 1 : index
    %c0_11 = arith.constant 0 : index
    %c0_12 = arith.constant 0 : index
    %10 = vector.load %arg4[%c1_10, %c0_11, %c0_12] : memref<2x5x4xf32, #tpu.memory_space<vmem>>, vector<1x5x4xf32>
    %11 = vector.shape_cast %10 : vector<1x5x4xf32> to vector<5x4xf32>
    %12 = vector.shape_cast %9 : vector<5x4xf32> to vector<1x5x4xf32>
    tpu.vector_store %arg4[%c1_10, %c0_11, %c0_12], %12 {strides = array<i32>} : memref<2x5x4xf32, #tpu.memory_space<vmem>>, vector<1x5x4xf32>,
    return
  }
  func.func @transform_0(%arg0: i32, %arg1: i32) -> (i32, i32) {
    %c0_i32 = arith.constant 0 : i32
    %c0_i32_0 = arith.constant 0 : i32
    %c0_i32_1 = arith.constant 0 : i32
    return %c0_i32, %c0_i32_0 : i32, i32
  }
  func.func @transform_1(%arg0: i32, %arg1: i32) -> (i32, i32, i32) {
    %c0_i32 = arith.constant 0 : i32
    %c0_i32_0 = arith.constant 0 : i32
    return %arg0, %c0_i32, %arg1 : i32, i32, i32
  }
  func.func @transform_2(%arg0: i32, %arg1: i32) -> (i32, i32, i32) {
    %c0_i32 = arith.constant 0 : i32
    %c0_i32_0 = arith.constant 0 : i32
    return %arg0, %c0_i32, %arg1 : i32, i32, i32
  }
}

</mosaic_0001>

<bundles_post_ra>
// kernel: adaptive_avg_pool2d.2
= control target key start
LH: loop header
LB: loop body
LE: loop exit
PB: predicated region body
PF: predicated region fallthrough
CT: control target
= control target key end

     0   :  { %s423_s9 = smov 0   ;;  %s425_s10 = smov 0   ;;  %s456_s0 = inlined_call_operand.vmem [shape: f32[5,16], index: 0, kind: input, shape index: {}]   ;;  %s457_s1 = inlined_call_operand.vmem [shape: f32[2,16,64], index: 1, kind: input, shape index: {}]   ;;  %s458_s2 = inlined_call_operand.vmem [shape: f32[2,5,64], index: 2, kind: output, shape index: {}]  }
   0x1   :  { %s427_s11 = smov 0  }
   0x2 LB: > { %s24_s12 = sadd.s32 1, %s399_s10  ;;  %p333_p0 = scmp.ge.s32.totalorder %s403_s11, 1  ;;  %s403_s11 = sphi %s427_s11, %s12_s11   ;;  %s399_s10 = sphi %s425_s10, %s460_s10   ;;  %s395_s9 = sphi %s423_s9, %s459_s9  }
   0x3   : > { %p26_p1 = scmp.ge.s32.totalorder %s24_s12, 2  ;;  %p131_p2 = scmp.lt.s32.totalorder %s403_s11, 3 }
   0x5   : > { %s462_s12 = smov (%p26_p1, %s24_s12), 0  ;;  %p132_p3 = pnand %p333_p0, %p131_p2 }
   0x6   : > { %p158_p4 = scmp.lt.s32.totalorder (!%p132_p3), %s395_s9, 1  ;;  %v405_v0 = vmov (!%p132_p3), 0.0|0.0   ;;  %vm406_vm0 = vmmov (!%p132_p3), 0   ;;  %v407_v1 = vmov (!%p132_p3), 0.0   ;;  %v173_v5 = vld [vmem:[%s456_s0] sm:$0x1f] (!%p132_p3) }
   0x7   : > { %135 = sbr.rel (%p132_p3) target bundleno = 236 (0xec), region = 28  ;;  %351 = vmatprep.subr.bf16.mxu0 (!%p132_p3), %v405_v0  ;;  %348 = vmatprep.mubr.msk.f32.mxu0 (!%p132_p3), %vm406_vm0, %v407_v1  ;;  %vm176_vm1 = vcmask (!%p132_p3), 130048   ;;  %vm250_vm2 = vcmask (!%p132_p3), 520192  }
   0xe   : > { %s464_s9 = smov (!%p158_p4, %s395_s9), 1 }
   0xf   : > { %s340_s13 = sshll.u32 %s464_s9, 4  ;;  %s336_s19 = sshll.u32 %s464_s9, 3 }
  0x10   : > { %s165_s16 = scalar_lea.vmem %s457_s1, %s340_s13  ;;  %s172_s22 = scalar_lea.vmem %s458_s2, %s336_s19 }
  0x11   : > { %v174_v2 = vld [vmem:[%s165_s16] sm:$0xff]  ;;  %v175_v3 = vld [vmem:[%s165_s16 + $0x8] sm:$0xff] }
  0x12   : > { %v352_v4 = vpack.c.bf16 %v175_v3, %v174_v2 }
  0x14   : > { %353 = vmatpush3.bf16.msra.mxu0 %v352_v4 }
  0x17   : > { %349 = vmatmul.mubr.msk.f32.vlgmr.msra.gmra.mrb[0].mxu0 %vm176_vm1, %v173_v5 }
  0xea   : > { %v246_v6 = vpop.f32.mrb[0].mxu0 }
  0xeb   : > { %251 = vst.msk [vmem:[%s172_s22] sm:$0x1f] %vm250_vm2, %v246_v6  ;;  %v350_v7 = vpop.f32.mrb[1].mxu0 }
  0xec PF: > { %s12_s11 = sadd.s32 1, %s403_s11   ;;  %s459_s9 = smov %s399_s10 }
  0xed   : > { %p9_p5 = scmp.ge.s32.totalorder %s12_s11, 4   ;;  %s460_s10 = smov %s462_s12 }
  0xef   :  { %11 = sbr.rel (!%p9_p5) target bundleno = 2 (0x2), region = 58 }

// kernel: adaptive_avg_pool2d.3
= control target key start
LH: loop header
LB: loop body
LE: loop exit
PB: predicated region body
PF: predicated region fallthrough
CT: control target
= control target key end

     0   :  { %s529_s9 = smov 0   ;;  %s531_s10 = smov 0   ;;  %s565_s0 = inlined_call_operand.vmem [shape: f32[5,16], index: 0, kind: input, shape index: {}]   ;;  %s566_s1 = inlined_call_operand.vmem [shape: f32[10,16,4], index: 1, kind: input, shape index: {}]   ;;  %s567_s2 = inlined_call_operand.vmem [shape: f32[10,5,4], index: 2, kind: output, shape index: {}]  }
   0x1   :  { %s533_s11 = smov 0  }
   0x2 LB: > { %s24_s12 = sadd.s32 1, %s505_s10  ;;  %p420_p0 = scmp.ge.s32.totalorder %s509_s11, 1  ;;  %s509_s11 = sphi %s533_s11, %s12_s11   ;;  %s505_s10 = sphi %s531_s10, %s569_s10   ;;  %s501_s9 = sphi %s529_s9, %s568_s9  }
   0x3   : > { %p26_p1 = scmp.ge.s32.totalorder %s24_s12, 5  ;;  %p133_p2 = scmp.lt.s32.totalorder %s509_s11, 6 }
   0x5   : > { %s571_s12 = smov (%p26_p1, %s24_s12), 0  ;;  %p134_p3 = pnand %p420_p0, %p133_p2 }
   0x6   : > { %s421_s13 = sshll.u32 (!%p134_p3), %s501_s9, 1  ;;  %v511_v0 = vmov (!%p134_p3), 0.0|0.0   ;;  %vm512_vm0 = vmmov (!%p134_p3), 0   ;;  %v513_v1 = vmov (!%p134_p3), 0.0   ;;  %v181_v8 = vld [vmem:[%s565_s0] sm:$0x1f] (!%p134_p3) }
   0x7   : > { %137 = sbr.rel (%p134_p3) target bundleno = 237 (0xed), region = 28  ;;  %454 = vmatprep.subr.bf16.mxu0 (!%p134_p3), %v511_v0  ;;  %457 = vmatprep.subr.bf16.mxu1 (!%p134_p3), %v511_v0  ;;  %p163_p4 = scmp.lt.s32.totalorder (!%p134_p3), %s421_s13, 9  ;;  %vm184_vm1 = vcmask (!%p134_p3), 130048   ;;  %vm258_vm2 = vcmask (!%p134_p3), 28672  }
   0x8   : > { %444 = vmatprep.mubr.msk.f32.mxu0 (!%p134_p3), %vm512_vm0, %v513_v1  ;;  %451 = vmatprep.mubr.msk.f32.mxu1 (!%p134_p3), %vm512_vm0, %v513_v1 }
   0xe   : > { %s573_s13 = smov (!%p163_p4, %s421_s13), 9 }
   0xf   : > { %s433_s14 = sshll.u32 %s573_s13, 4  ;;  %s425_s20 = sshll.u32 %s573_s13, 3 }
  0x10   : > { %s170_s17 = scalar_lea.vmem %s566_s1, %s433_s14  ;;  %s179_s23 = scalar_lea.vmem %s567_s2, %s425_s20 }
  0x11   : > { %v182_v2 = vld [vmem:[%s170_s17] sm:$0xff]  ;;  %v183_v3 = vld [vmem:[%s170_s17 + $0x8] sm:$0xff]  ;;  %v427_v4 = vld [vmem:[%s170_s17 + $0x10] sm:$0xff] }
  0x12   : > { %v455_v5 = vpack.c.bf16 %v183_v3, %v182_v2  ;;  %v428_v6 = vld [vmem:[%s170_s17 + $0x18] sm:$0xff] }
  0x13   : > { %v458_v7 = vpack.c.bf16 %v428_v6, %v427_v4 }
  0x14   : > { %456 = vmatpush3.bf16.msra.mxu0 %v455_v5 }
  0x15   : > { %459 = vmatpush3.bf16.msra.mxu1 %v458_v7 }
  0x17   : > { %445 = vmatmul.mubr.msk.f32.vlgmr.msra.gmra.mrb[0].mxu0 %vm184_vm1, %v181_v8 }
  0x18   : > { %452 = vmatmul.mubr.msk.f32.vlgmr.msra.gmra.mrb[0].mxu1 %vm184_vm1, %v181_v8 }
  0xea   : > { %v254_v9 = vpop.f32.mrb[0].mxu0 }
  0xeb   : > { %259 = vst.msk [vmem:[%s179_s23] sm:$0x1f] %vm258_vm2, %v254_v9  ;;  %v329_v10 = vpop.f32.mrb[0].mxu1  ;;  %v446_v11 = vpop.f32.mrb[1].mxu0 }
  0xec   : > { %430 = vst.msk [vmem:[%s179_s23 + $0x8] sm:$0x1f] %vm258_vm2, %v329_v10  ;;  %v453_v12 = vpop.f32.mrb[1].mxu1 }
  0xed PF: > { %s12_s11 = sadd.s32 1, %s509_s11   ;;  %s568_s9 = smov %s505_s10 }
  0xee   : > { %p9_p5 = scmp.ge.s32.totalorder %s12_s11, 7   ;;  %s569_s10 = smov %s571_s12 }
  0xf0   :  { %11 = sbr.rel (!%p9_p5) target bundleno = 2 (0x2), region = 60 }

</bundles_post_ra>
